<compile_context>
chip_gen: v5e
topology: v5e:2x2
jax: 0.10.0
libtpu: 0.0.40
codegen_flags: <defaults>
</compile_context>

<pallas_src>
import math

import jax
import jax.numpy as jnp
from jax import lax
from jax.experimental import pallas as pl
from jax.experimental.pallas import tpu as pltpu

_MASK_VALUE = -1e30  # hard in-kernel causal mask (exp underflows to exactly 0)


# ----------------------------- tiling helpers -----------------------------

def _pick_tile(dim, pref, align):
    """Largest tile <= pref that divides dim and is `align`-aligned (or the full dim)."""
    if dim <= pref:
        return dim
    t = (pref // align) * align
    while t >= align:
        if dim % t == 0:
            return t
        t -= align
    return dim  # full-dim fallback; guarded by _check_vmem_budget below


def _check_vmem_budget(name, block_bytes, limit=48 * 1024 * 1024):
    total = 2 * sum(int(b) for b in block_bytes)  # ~double-buffered working set
    if total > limit:
        raise ValueError(
            f"{name}: estimated VMEM working set {total / 2**20:.1f} MiB exceeds "
            f"{limit / 2**20:.1f} MiB budget (v7x-safe); choose smaller tiles.")


# ----------------------------- tiled linear (MXU) -----------------------------

def _matmul_kernel(x_ref, w_ref, o_ref, acc_ref):
    @pl.when(pl.program_id(2) == 0)
    def _init():
        acc_ref[...] = jnp.zeros_like(acc_ref)

    acc_ref[...] += jnp.dot(x_ref[...], w_ref[...], preferred_element_type=jnp.float32)

    @pl.when(pl.program_id(2) == pl.num_programs(2) - 1)
    def _done():
        o_ref[...] = acc_ref[...].astype(o_ref.dtype)


def pallas_linear(x, wt, *, tm=512, tn=512, tk=1024):
    """y = x @ wt, where wt is the pre-transposed nn.Linear weight, shape (K, N)."""
    M, K = x.shape
    K2, N = wt.shape
    assert K == K2
    itemsize = x.dtype.itemsize
    sub_align = 16 if itemsize == 2 else 8   # bf16 min sublane tile is (16, 128)
    tm = _pick_tile(M, tm, sub_align)
    tn = _pick_tile(N, tn, 128)
    tk = _pick_tile(K, tk, 128)
    _check_vmem_budget("pallas_linear",
                       [tm * tk * itemsize, tk * tn * itemsize,
                        tm * tn * itemsize, tm * tn * 4])
    grid = (M // tm, N // tn, K // tk)
    cost = pl.CostEstimate(
        flops=2 * M * N * K,
        transcendentals=0,
        bytes_accessed=itemsize * (M * K + K * N + M * N),
    )
    return pl.pallas_call(
        _matmul_kernel,
        out_shape=jax.ShapeDtypeStruct((M, N), x.dtype),
        grid_spec=pltpu.PrefetchScalarGridSpec(
            num_scalar_prefetch=0,
            grid=grid,
            in_specs=[
                pl.BlockSpec((tm, tk), lambda i, j, k: (i, k)),
                pl.BlockSpec((tk, tn), lambda i, j, k: (k, j)),
            ],
            out_specs=pl.BlockSpec((tm, tn), lambda i, j, k: (i, j)),
            scratch_shapes=[pltpu.VMEM((tm, tn), jnp.float32)],
        ),
        compiler_params=pltpu.CompilerParams(
            dimension_semantics=("parallel", "parallel", "arbitrary")),
        cost_estimate=cost,
    )(x, wt)


# ----------------------------- flash attention core -----------------------------

def _make_flash_kernel(*, n_rep, head_dim, tq, tkv, scale, causal):
    D = head_dim
    half = D // 2

    def kernel(*refs):
        if causal:
            (q_ref, k_ref, v_ref, cos_ref, sin_ref,
             o_ref, m_sc, l_sc, acc_sc, qrope_sc) = refs
            mask_ref = None
        else:
            (q_ref, k_ref, v_ref, cos_ref, sin_ref, mask_ref,
             o_ref, m_sc, l_sc, acc_sc, qrope_sc) = refs

        qi = pl.program_id(2)
        ki = pl.program_id(3)
        q_start = pl.multiple_of(qi * tq, tq)
        k_start = pl.multiple_of(ki * tkv, tkv)

        @pl.when(ki == 0)
        def _init():
            m_sc[...] = jnp.full_like(m_sc, _MASK_VALUE)
            l_sc[...] = jnp.zeros_like(l_sc)
            acc_sc[...] = jnp.zeros_like(acc_sc)
            # RoPE + 1/sqrt(D) folded into q, computed ONCE per q tile and cached.
            cos_q = cos_ref[0, pl.ds(q_start, tq), :].astype(jnp.float32)
            sin_q = sin_ref[0, pl.ds(q_start, tq), :].astype(jnp.float32)
            for r in range(n_rep):
                qh = q_ref[0, :, r * D:(r + 1) * D].astype(jnp.float32)
                qh_rot = pltpu.roll(qh, half, 1)  # rotate-half sign folded into sin table
                qrope_sc[r] = ((qh * cos_q + qh_rot * sin_q) * scale).astype(qrope_sc.dtype)

        def _compute():
            cos_k = cos_ref[0, pl.ds(k_start, tkv), :].astype(jnp.float32)
            sin_k = sin_ref[0, pl.ds(k_start, tkv), :].astype(jnp.float32)
            kk = k_ref[0].astype(jnp.float32)                        # (tkv, D)
            kk_rot = pltpu.roll(kk, half, 1)
            k_rope = (kk * cos_k + kk_rot * sin_k).astype(qrope_sc.dtype)
            vv = v_ref[0]                                            # (tkv, D)

            if causal:
                rows = q_start + lax.broadcasted_iota(jnp.int32, (tq, tkv), 0)
                cols = k_start + lax.broadcasted_iota(jnp.int32, (tq, tkv), 1)
                allowed = cols <= rows
            else:
                bias = mask_ref[0, 0].astype(jnp.float32)            # (tq, tkv)

            for r in range(n_rep):
                # scores: contract D vs D (no k transpose), f32 accumulation on the MXU.
                s = lax.dot_general(qrope_sc[r], k_rope, (((1,), (1,)), ((), ())),
                                    preferred_element_type=jnp.float32)
                if causal:
                    s = jnp.where(allowed, s, _MASK_VALUE)
                else:
                    s = s + bias
                m_prev = m_sc[r]
                m_new = jnp.maximum(m_prev, jnp.max(s, axis=-1, keepdims=True))
                alpha = jnp.exp(m_prev - m_new)
                p = jnp.exp(s - m_new)
                l_sc[r] = alpha * l_sc[r] + jnp.sum(p, axis=-1, keepdims=True)
                acc_sc[r] = alpha * acc_sc[r] + jnp.dot(
                    p.astype(vv.dtype), vv, preferred_element_type=jnp.float32)
                m_sc[r] = m_new

        if causal:
            # Skip kv tiles strictly in the future of this q tile.
            pl.when(k_start < (qi + 1) * tq)(_compute)
        else:
            _compute()

        @pl.when(ki == pl.num_programs(3) - 1)
        def _done():
            for r in range(n_rep):
                l = l_sc[r]
                inv = pl.reciprocal(l, approx=True)   # EUP slot
                inv = inv * (2.0 - l * inv)           # one Newton step
                o_ref[0, :, r * D:(r + 1) * D] = (acc_sc[r] * inv).astype(o_ref.dtype)

    return kernel


def pallas_flash_attention(qkv, cos_pos, sin_pos, *, num_heads, num_kv_heads, head_dim,
                           mask=None, tq=512, tkv=512):
    """Flash attention reading directly from the fused QKV slab.

    qkv:      (B, S, (nH + 2*kvH) * D)  -- [q | k | v] columns from the fused projection.
    cos_pos:  (B, S, D)                  -- cos table gathered by position_ids.
    sin_pos:  (B, S, D)                  -- sin table with rotate-half sign pre-folded.
    mask:     optional (B, 1, S, S) additive mask; if None, causal mask is generated
              in-kernel and future kv tiles are skipped.
    Output:   (B, S, nH * D) in the same dtype as qkv (lane-dense, ready for o_proj).
    """
    B, S, total = qkv.shape
    nH, kvH, D = num_heads, num_kv_heads, head_dim
    assert nH % kvH == 0
    n_rep = nH // kvH
    assert total == (nH + 2 * kvH) * D
    if D % 128 != 0:
        # TODO(synk): support head_dim that is not a multiple of 128 (lane-padded layout).
        raise ValueError("pallas_flash_attention requires head_dim % 128 == 0")

    itemsize = qkv.dtype.itemsize
    sub_align = 16 if itemsize == 2 else 8
    tq = _pick_tile(S, tq, sub_align)
    tkv = _pick_tile(S, tkv, 128)
    causal = mask is None
    scale = 1.0 / math.sqrt(D)

    grid = (B, kvH, S // tq, S // tkv)

    if causal:
        def kv_block(qi, ki):
            # Clamp skipped (future) steps onto the diagonal block -> DMA dedup.
            return jnp.minimum(ki, ((qi + 1) * tq - 1) // tkv)
    else:
        def kv_block(qi, ki):
            return ki

    q_spec = pl.BlockSpec((1, tq, n_rep * D), lambda b, g, qi, ki: (b, qi, g))
    k_spec = pl.BlockSpec((1, tkv, D),
                          lambda b, g, qi, ki: (b, kv_block(qi, ki), nH + g))
    v_spec = pl.BlockSpec((1, tkv, D),
                          lambda b, g, qi, ki: (b, kv_block(qi, ki), nH + kvH + g))
    cos_spec = pl.BlockSpec((1, S, D), lambda b, g, qi, ki: (b, 0, 0))   # resident per b
    sin_spec = pl.BlockSpec((1, S, D), lambda b, g, qi, ki: (b, 0, 0))

    in_specs = [q_spec, k_spec, v_spec, cos_spec, sin_spec]
    inputs = [qkv, qkv, qkv, cos_pos, sin_pos]
    if not causal:
        in_specs.append(pl.BlockSpec((1, 1, tq, tkv),
                                     lambda b, g, qi, ki: (b, 0, qi, ki)))
        inputs.append(mask)

    out_spec = pl.BlockSpec((1, tq, n_rep * D), lambda b, g, qi, ki: (b, qi, g))
    out_shape = jax.ShapeDtypeStruct((B, S, nH * D), qkv.dtype)

    _check_vmem_budget("pallas_flash_attention", [
        tq * n_rep * D * itemsize,                    # q block
        2 * tkv * D * itemsize,                       # k + v blocks
        2 * S * D * itemsize,                         # resident cos + sin
        tq * n_rep * D * itemsize,                    # output block
        (0 if causal else tq * tkv * itemsize),       # mask block (fallback path)
        n_rep * tq * (8 + 4 * D + itemsize * D),      # scratch (m, l, acc, cached q)
    ])

    cost = pl.CostEstimate(
        flops=(2 if causal else 4) * B * nH * S * S * D,
        transcendentals=B * nH * S * S // (2 if causal else 1),
        bytes_accessed=itemsize * (B * S * nH * D
                                   + 2 * B * kvH * (S // tq) * S * D
                                   + B * S * nH * D),
    )

    kernel = _make_flash_kernel(n_rep=n_rep, head_dim=D, tq=tq, tkv=tkv,
                                scale=scale, causal=causal)
    return pl.pallas_call(
        kernel,
        out_shape=out_shape,
        grid_spec=pltpu.PrefetchScalarGridSpec(
            num_scalar_prefetch=0,
            grid=grid,
            in_specs=in_specs,
            out_specs=out_spec,
            scratch_shapes=[
                pltpu.VMEM((n_rep, tq, 1), jnp.float32),    # running max  m
                pltpu.VMEM((n_rep, tq, 1), jnp.float32),    # running sum  l
                pltpu.VMEM((n_rep, tq, D), jnp.float32),    # output accumulator
                pltpu.VMEM((n_rep, tq, D), qkv.dtype),      # cached RoPE'd + scaled q
            ],
        ),
        compiler_params=pltpu.CompilerParams(
            dimension_semantics=("parallel", "parallel", "parallel", "arbitrary")),
        cost_estimate=cost,
    )(*inputs)


# ----------------------------- RoPE tables / reference helpers -----------------------------

def rope_tables(seq_len, head_dim, base=10000.0):
    inv_freq = 1.0 / (base ** (jnp.arange(0, head_dim, 2, dtype=jnp.float32) / head_dim))
    t = jnp.arange(seq_len, dtype=jnp.float32)
    freqs = jnp.einsum("i,j->ij", t, inv_freq)            # (S, D/2)
    emb = jnp.concatenate([freqs, freqs], axis=-1)        # (S, D)
    return jnp.cos(emb), jnp.sin(emb)


def rotate_half(x):
    d = x.shape[-1] // 2
    return jnp.concatenate([-x[..., d:], x[..., :d]], axis=-1)


def apply_rotary_pos_emb(q, k, cos, sin, position_ids):
    cos = cos[position_ids][:, None, :, :]
    sin = sin[position_ids][:, None, :, :]
    return q * cos + rotate_half(q) * sin, k * cos + rotate_half(k) * sin


def repeat_kv(x, n_rep):
    return x if n_rep == 1 else jnp.repeat(x, n_rep, axis=1)


# ----------------------------- Module-equivalent forward -----------------------------

class LlamaAttentionNPUPallas:
    def __init__(self, hidden_size, num_heads, num_kv_heads, rope_theta=10000.0,
                 seed=0, compute_dtype=jnp.bfloat16):
        self.hidden_size = hidden_size
        self.num_heads = num_heads
        self.num_kv_heads = num_kv_heads
        self.head_dim = hidden_size // num_heads
        self.num_kv_groups = num_heads // num_kv_heads
        self.rope_theta = rope_theta
        self.compute_dtype = compute_dtype

        key = jax.random.PRNGKey(seed)
        kq, kk, kv_, ko = jax.random.split(key, 4)
        scale = 1.0 / math.sqrt(hidden_size)
        # nn.Linear weight shape: (out_features, in_features), bias=False (f32 masters).
        self.q_w = jax.random.normal(kq, (num_heads * self.head_dim, hidden_size), jnp.float32) * scale
        self.k_w = jax.random.normal(kk, (num_kv_heads * self.head_dim, hidden_size), jnp.float32) * scale
        self.v_w = jax.random.normal(kv_, (num_kv_heads * self.head_dim, hidden_size), jnp.float32) * scale
        self.o_w = jax.random.normal(ko, (hidden_size, num_heads * self.head_dim), jnp.float32) * scale

        # Fused QKV weight, pre-transposed to (K, N) and pre-cast to the MXU compute dtype.
        self.qkv_wT = jnp.concatenate([self.q_w, self.k_w, self.v_w], axis=0).T.astype(compute_dtype)
        self.o_wT = self.o_w.T.astype(compute_dtype)

        # rotate_half(x) == roll(x, D/2) * sign  ->  fold the sign into the sin table.
        d = self.head_dim // 2
        self._rope_sign = jnp.concatenate(
            [-jnp.ones((d,), jnp.float32), jnp.ones((d,), jnp.float32)])

    def __call__(self, hidden_states, attention_mask=None, position_ids=None):
        B, S, H = hidden_states.shape
        nH, kvH, D = self.num_heads, self.num_kv_heads, self.head_dim
        cd = self.compute_dtype
        if position_ids is None:
            position_ids = jnp.broadcast_to(jnp.arange(S, dtype=jnp.int32)[None, :], (B, S))

        x2d = hidden_states.astype(cd).reshape(B * S, H)
        qkv = pallas_linear(x2d, self.qkv_wT).reshape(B, S, (nH + 2 * kvH) * D)

        cos, sin = rope_tables(S, D, base=self.rope_theta)
        cos_pos = cos[position_ids].astype(cd)                         # (B, S, D)
        sin_pos = (sin * self._rope_sign)[position_ids].astype(cd)     # sign pre-folded

        mask = None if attention_mask is None else attention_mask.astype(cd)
        attn = pallas_flash_attention(qkv, cos_pos, sin_pos, num_heads=nH,
                                      num_kv_heads=kvH, head_dim=D, mask=mask)

        out = pallas_linear(attn.reshape(B * S, nH * D), self.o_wT)
        return out.reshape(B, S, H).astype(hidden_states.dtype)


# ----------------------------- pure-JAX reference -----------------------------

def reference_forward(mod, hidden_states, attention_mask, position_ids):
    with jax.default_matmul_precision("highest"):
        B, S, H = hidden_states.shape
        if attention_mask is None:
            causal = jnp.triu(jnp.full((S, S), jnp.float32(-1e9)), k=1)
            attention_mask = jnp.broadcast_to(causal[None, None, :, :], (B, 1, S, S))
        q = hidden_states @ mod.q_w.T
        k = hidden_states @ mod.k_w.T
        v = hidden_states @ mod.v_w.T
        q = q.reshape(B, S, mod.num_heads, mod.head_dim).transpose(0, 2, 1, 3)
        k = k.reshape(B, S, mod.num_kv_heads, mod.head_dim).transpose(0, 2, 1, 3)
        v = v.reshape(B, S, mod.num_kv_heads, mod.head_dim).transpose(0, 2, 1, 3)
        cos, sin = rope_tables(S, mod.head_dim, base=mod.rope_theta)
        q, k = apply_rotary_pos_emb(q, k, cos, sin, position_ids)
        k = repeat_kv(k, mod.num_kv_groups)
        v = repeat_kv(v, mod.num_kv_groups)
        s = jnp.einsum("bhqd,bhkd->bhqk", q, k) / math.sqrt(mod.head_dim)
        s = s + attention_mask
        p = jax.nn.softmax(s.astype(jnp.float32), axis=-1).astype(q.dtype)
        o = jnp.einsum("bhqk,bhkd->bhqd", p, v)
        o = o.transpose(0, 2, 1, 3).reshape(B, S, mod.hidden_size)
        return o @ mod.o_w.T


# ----------------------------- main -----------------------------

def _run_case(B, S, HID, NUM_HEADS, NUM_KV_HEADS, compute_dtype, explicit_mask, atol, rtol):
    key = jax.random.PRNGKey(0)
    hidden_states = jax.random.normal(key, (B, S, HID), jnp.float32)
    position_ids = jnp.broadcast_to(jnp.arange(S, dtype=jnp.int32)[None, :], (B, S))

    if explicit_mask:
        neg = jnp.float32(-1e9)
        causal = jnp.triu(jnp.full((S, S), neg, jnp.float32), k=1)
        attention_mask = jnp.broadcast_to(causal[None, None, :, :], (B, 1, S, S))
    else:
        attention_mask = None   # causal mask generated in-kernel

    mod = LlamaAttentionNPUPallas(HID, NUM_HEADS, NUM_KV_HEADS, rope_theta=10000.0,
                                  seed=0, compute_dtype=compute_dtype)
    out = jax.block_until_ready(mod(hidden_states, attention_mask, position_ids))
    assert out.shape == (B, S, HID)

    ref = reference_forward(mod, hidden_states, attention_mask, position_ids)
    out_f = out.astype(jnp.float32)
    max_err = float(jnp.max(jnp.abs(out_f - ref)))
    ok = bool(jnp.allclose(out_f, ref, atol=atol, rtol=rtol))
    assert ok, (f"Pallas output mismatch vs JAX reference "
                f"(dtype={compute_dtype}, explicit_mask={explicit_mask}, max_err={max_err})")


if __name__ == "__main__":
    # Small structural check in f32 (tight tolerance), causal mask generated in-kernel.
    _run_case(B=2, S=8, HID=256, NUM_HEADS=2, NUM_KV_HEADS=1,
              compute_dtype=jnp.float32, explicit_mask=False, atol=5e-2, rtol=5e-2)
    # Small bf16 check exercising the explicit additive-mask fallback path.
    _run_case(B=2, S=8, HID=256, NUM_HEADS=2, NUM_KV_HEADS=1,
              compute_dtype=jnp.bfloat16, explicit_mask=True, atol=1.5e-1, rtol=1.5e-1)
    # Realistic head_dim=128 shapes: bf16 MXU path, multi-tile flash grid with causal
    # tile skipping, GQA group blocking (n_rep=2), K-streaming fused QKV / o_proj GEMMs.
    _run_case(B=1, S=1024, HID=1024, NUM_HEADS=8, NUM_KV_HEADS=4,
              compute_dtype=jnp.bfloat16, explicit_mask=False, atol=2.5e-1, rtol=2.5e-1)
    print("KERNEL_OK")
</pallas_src>

<mosaic_0001>
module attributes {stable_mosaic.version = 11 : i64} {
  func.func @_matmul_kernel(%arg0: i32, %arg1: i32, %arg2: i32, %arg3: memref<16x256xf32, #tpu.memory_space<vmem>>, %arg4: memref<256x512xf32, #tpu.memory_space<vmem>>, %arg5: memref<16x512xf32, #tpu.memory_space<vmem>>, %arg6: memref<16x512xf32, #tpu.memory_space<vmem>>) attributes {dimension_semantics = [#tpu.dimension_semantics<parallel>, #tpu.dimension_semantics<parallel>, #tpu.dimension_semantics<arbitrary>], iteration_bounds = array<i64: 1, 1, 1>, scalar_prefetch = 0 : i64, scratch_operands = 1 : i64, tpu.core_type = #tpu.core_type<tc>, window_params = [{transform_indices = @transform_0, window_bounds = array<i64: 16, 256>}, {transform_indices = @transform_1, window_bounds = array<i64: 256, 512>}, {transform_indices = @transform_2, window_bounds = array<i64: 16, 512>}]} {
    %c0_i32 = arith.constant 0 : i32
    %0 = arith.cmpi eq, %arg2, %c0_i32 : i32
    %1 = arith.extui %0 : i1 to i32
    %c0_i32_0 = arith.constant 0 : i32
    %2 = arith.cmpi ne, %1, %c0_i32_0 : i32
    scf.if %2 {
      %cst_10 = arith.constant 0.000000e+00 : f32
      %12 = vector.broadcast %cst_10 : f32 to vector<16x512xf32>
      %c0_11 = arith.constant 0 : index
      %c0_12 = arith.constant 0 : index
      %13 = vector.load %arg6[%c0_11, %c0_12] : memref<16x512xf32, #tpu.memory_space<vmem>>, vector<16x512xf32>
      tpu.vector_store %arg6[%c0_11, %c0_12], %12 {strides = array<i32>} : memref<16x512xf32, #tpu.memory_space<vmem>>, vector<16x512xf32>,
    } else {
    }
    %c0 = arith.constant 0 : index
    %c0_1 = arith.constant 0 : index
    %3 = vector.load %arg6[%c0, %c0_1] : memref<16x512xf32, #tpu.memory_space<vmem>>, vector<16x512xf32>
    %c0_2 = arith.constant 0 : index
    %c0_3 = arith.constant 0 : index
    %4 = vector.load %arg3[%c0_2, %c0_3] : memref<16x256xf32, #tpu.memory_space<vmem>>, vector<16x256xf32>
    %c0_4 = arith.constant 0 : index
    %c0_5 = arith.constant 0 : index
    %5 = vector.load %arg4[%c0_4, %c0_5] : memref<256x512xf32, #tpu.memory_space<vmem>>, vector<256x512xf32>
    %cst = arith.constant dense<0.000000e+00> : vector<16x512xf32>
    %6 = tpu.matmul %4, %5, %cst {dimension_numbers = #tpu.dot_dimension_numbers<[1], [0], [0], [1], [0, 0, 1, 1], [], []>} : vector<16x256xf32>, vector<256x512xf32>, vector<16x512xf32> -> vector<16x512xf32>
    %7 = arith.addf %3, %6 : vector<16x512xf32>
    %c0_6 = arith.constant 0 : index
    %c0_7 = arith.constant 0 : index
    %8 = vector.load %arg6[%c0_6, %c0_7] : memref<16x512xf32, #tpu.memory_space<vmem>>, vector<16x512xf32>
    tpu.vector_store %arg6[%c0_6, %c0_7], %7 {strides = array<i32>} : memref<16x512xf32, #tpu.memory_space<vmem>>, vector<16x512xf32>,
    %c0_i32_8 = arith.constant 0 : i32
    %9 = arith.cmpi eq, %arg2, %c0_i32_8 : i32
    %10 = arith.extui %9 : i1 to i32
    %c0_i32_9 = arith.constant 0 : i32
    %11 = arith.cmpi ne, %10, %c0_i32_9 : i32
    scf.if %11 {
      %c0_10 = arith.constant 0 : index
      %c0_11 = arith.constant 0 : index
      %12 = vector.load %arg6[%c0_10, %c0_11] : memref<16x512xf32, #tpu.memory_space<vmem>>, vector<16x512xf32>
      %c0_12 = arith.constant 0 : index
      %c0_13 = arith.constant 0 : index
      %13 = vector.load %arg5[%c0_12, %c0_13] : memref<16x512xf32, #tpu.memory_space<vmem>>, vector<16x512xf32>
      tpu.vector_store %arg5[%c0_12, %c0_13], %12 {strides = array<i32>} : memref<16x512xf32, #tpu.memory_space<vmem>>, vector<16x512xf32>,
    } else {
    }
    return
  }
  func.func @transform_0(%arg0: i32, %arg1: i32, %arg2: i32) -> (i32, i32) {
    %c0_i32 = arith.constant 0 : i32
    return %arg0, %arg2 : i32, i32
  }
  func.func @transform_1(%arg0: i32, %arg1: i32, %arg2: i32) -> (i32, i32) {
    %c0_i32 = arith.constant 0 : i32
    return %arg2, %arg1 : i32, i32
  }
  func.func @transform_2(%arg0: i32, %arg1: i32, %arg2: i32) -> (i32, i32) {
    %c0_i32 = arith.constant 0 : i32
    return %arg0, %arg1 : i32, i32
  }
}

</mosaic_0001>

<bundles_post_ra>
// kernel: tpu_custom_call.1
= control target key start
LH: loop header
LB: loop body
LE: loop exit
PB: predicated region body
PF: predicated region fallthrough
CT: control target
= control target key end

     0   :  { %7 = vsyncpa [#allocation4], 0  ;;  %s569_s0 = inlined_call_operand.hbm [shape: f32[16,256], index: 0, kind: input, shape index: {}]   ;;  %s570_s1 = inlined_call_operand.hbm [shape: f32[256,512], index: 1, kind: input, shape index: {}]   ;;  %s571_s2 = inlined_call_operand.hbm [shape: f32[16,512], index: 2, kind: output, shape index: {}]  }
   0x1   :  { %8 = vsyncpa [#allocation7], 0 }
   0x2   :  { %9 = vsyncpa [#allocation5], 0  ;;  %s14_s11 = sshll.u32 %s569_s0, 4  ;;  %s520_s12 = smov [#allocation3]   ;;  %s15_s11 = int_to_ptr.hbm [resolvable:$true] %s14_s11 }
   0x3   :  { %s16_s13 = sshll.u32 %s520_s12, 4  ;;  %s27_s16 = sshll.u32 %s570_s1, 4  ;;  %s17_s13 = int_to_ptr.vmem [resolvable:$true] %s16_s13  ;;  %s28_s16 = int_to_ptr.hbm [resolvable:$true] %s27_s16 }
   0x4   :  { %s521_s17 = smov 256   ;;  %s522_s18 = smov 16  }
   0x5   :  { %22 = dma.hbm_to_vmem [thread:$0]  %s15_s11, 512, %s17_s13, [#allocation4], %s521_s17, %s521_s17, %s522_s18  }
   0x6   :  { %s523_s19 = smov [#allocation6]   ;;  %s524_s21 = smov 512  }
   0x7   :  { %s29_s20 = sshll.u32 %s523_s19, 4  ;;  %s525_s22 = smov 32   ;;  %s30_s20 = int_to_ptr.vmem [resolvable:$true] %s29_s20 }
   0x8   :  { %35 = dma.hbm_to_vmem [thread:$0]  %s28_s16, 16384, %s30_s20, [#allocation7], %s524_s21, %s524_s21, %s525_s22  }
   0x9   :  { %514 = dma.done.wait [#allocation4], 512  }
   0xa   :  { %515 = vsyncadd [#allocation4], 4294966784 }
   0xb   :  { %516 = dma.done.wait [#allocation7], 16384  }
   0xc   :  { %517 = vsyncadd [#allocation7], 4294950912  ;;  %v129_v0 = vld [vmem:[#allocation6 + $0x1e8] sm:$0xff]  ;;  %v128_v6 = vld [vmem:[#allocation6 + $0x1e0] sm:$0xff]  ;;  %s526_s0 = smov [#allocation8]   ;;  %s421_s25 = sshll.u32 %s571_s2, 4  ;;  %s422_s25 = int_to_ptr.hbm [resolvable:$true] %s421_s25 }
   0xd   :  { %v193_v1 = vld [vmem:[#allocation6 + $0x3e8] sm:$0xff]  ;;  %242 = vmatpush.msra.mxu2 %v129_v0  ;;  %v192_v7 = vld [vmem:[#allocation6 + $0x3e0] sm:$0xff]  ;;  %196 = vmatpush.msra.mxu0 %v128_v6  ;;  %v131_v60 = vld [vmem:[#allocation6 + $0x1f8] sm:$0xff]  ;;  %s419_s1 = sshll.u32 %s526_s0, 4  ;;  %s420_s1 = int_to_ptr.vmem [resolvable:$true] %s419_s1 }
   0xe   :  { %v125_v2 = vld [vmem:[#allocation6 + $0x1c8] sm:$0xff]  ;;  %265 = vmatpush.msra.mxu3 %v193_v1  ;;  %v124_v8 = vld [vmem:[#allocation6 + $0x1c0] sm:$0xff]  ;;  %219 = vmatpush.msra.mxu1 %v192_v7  ;;  %v195_v61 = vld [vmem:[#allocation6 + $0x3f8] sm:$0xff] }
   0xf   :  { %v189_v3 = vld [vmem:[#allocation6 + $0x3c8] sm:$0xff]  ;;  %243 = vmatpush.msra.mxu2 %v125_v2  ;;  %v188_v9 = vld [vmem:[#allocation6 + $0x3c0] sm:$0xff]  ;;  %197 = vmatpush.msra.mxu0 %v124_v8  ;;  %v127_v0 = vld [vmem:[#allocation6 + $0x1d8] sm:$0xff] }
  0x10   :  { %v121_v4 = vld [vmem:[#allocation6 + $0x1a8] sm:$0xff]  ;;  %266 = vmatpush.msra.mxu3 %v189_v3  ;;  %v120_v12 = vld [vmem:[#allocation6 + $0x1a0] sm:$0xff]  ;;  %220 = vmatpush.msra.mxu1 %v188_v9  ;;  %v191_v1 = vld [vmem:[#allocation6 + $0x3d8] sm:$0xff] }
  0x11   :  { %v185_v5 = vld [vmem:[#allocation6 + $0x3a8] sm:$0xff]  ;;  %244 = vmatpush.msra.mxu2 %v121_v4  ;;  %v184_v13 = vld [vmem:[#allocation6 + $0x3a0] sm:$0xff]  ;;  %198 = vmatpush.msra.mxu0 %v120_v12  ;;  %v123_v4 = vld [vmem:[#allocation6 + $0x1b8] sm:$0xff] }
  0x12   :  { %v117_v10 = vld [vmem:[#allocation6 + $0x188] sm:$0xff]  ;;  %267 = vmatpush.msra.mxu3 %v185_v5  ;;  %v116_v16 = vld [vmem:[#allocation6 + $0x180] sm:$0xff]  ;;  %221 = vmatpush.msra.mxu1 %v184_v13  ;;  %v187_v5 = vld [vmem:[#allocation6 + $0x3b8] sm:$0xff] }
  0x13   :  { %v181_v11 = vld [vmem:[#allocation6 + $0x388] sm:$0xff]  ;;  %245 = vmatpush.msra.mxu2 %v117_v10  ;;  %v180_v17 = vld [vmem:[#allocation6 + $0x380] sm:$0xff]  ;;  %199 = vmatpush.msra.mxu0 %v116_v16  ;;  %v130_v6 = vld [vmem:[#allocation6 + $0x1f0] sm:$0xff] }
  0x14   :  { %v113_v14 = vld [vmem:[#allocation6 + $0x168] sm:$0xff]  ;;  %268 = vmatpush.msra.mxu3 %v181_v11  ;;  %v112_v20 = vld [vmem:[#allocation6 + $0x160] sm:$0xff]  ;;  %222 = vmatpush.msra.mxu1 %v180_v17  ;;  %v194_v7 = vld [vmem:[#allocation6 + $0x3f0] sm:$0xff] }
  0x15   :  { %v177_v15 = vld [vmem:[#allocation6 + $0x368] sm:$0xff]  ;;  %246 = vmatpush.msra.mxu2 %v113_v14  ;;  %v176_v21 = vld [vmem:[#allocation6 + $0x360] sm:$0xff]  ;;  %200 = vmatpush.msra.mxu0 %v112_v20  ;;  %v119_v8 = vld [vmem:[#allocation6 + $0x198] sm:$0xff] }
  0x16   :  { %v109_v18 = vld [vmem:[#allocation6 + $0x148] sm:$0xff]  ;;  %269 = vmatpush.msra.mxu3 %v177_v15  ;;  %v108_v24 = vld [vmem:[#allocation6 + $0x140] sm:$0xff]  ;;  %223 = vmatpush.msra.mxu1 %v176_v21  ;;  %v183_v9 = vld [vmem:[#allocation6 + $0x398] sm:$0xff] }
  0x17   :  { %v173_v19 = vld [vmem:[#allocation6 + $0x348] sm:$0xff]  ;;  %247 = vmatpush.msra.mxu2 %v109_v18  ;;  %v172_v25 = vld [vmem:[#allocation6 + $0x340] sm:$0xff]  ;;  %201 = vmatpush.msra.mxu0 %v108_v24  ;;  %v126_v10 = vld [vmem:[#allocation6 + $0x1d0] sm:$0xff] }
  0x18   :  { %v105_v22 = vld [vmem:[#allocation6 + $0x128] sm:$0xff]  ;;  %270 = vmatpush.msra.mxu3 %v173_v19  ;;  %v104_v28 = vld [vmem:[#allocation6 + $0x120] sm:$0xff]  ;;  %224 = vmatpush.msra.mxu1 %v172_v25  ;;  %v190_v11 = vld [vmem:[#allocation6 + $0x3d0] sm:$0xff] }
  0x19   :  { %v169_v23 = vld [vmem:[#allocation6 + $0x328] sm:$0xff]  ;;  %248 = vmatpush.msra.mxu2 %v105_v22  ;;  %v168_v29 = vld [vmem:[#allocation6 + $0x320] sm:$0xff]  ;;  %202 = vmatpush.msra.mxu0 %v104_v28  ;;  %v115_v12 = vld [vmem:[#allocation6 + $0x178] sm:$0xff] }
  0x1a   :  { %v101_v26 = vld [vmem:[#allocation6 + $0x108] sm:$0xff]  ;;  %271 = vmatpush.msra.mxu3 %v169_v23  ;;  %v100_v32 = vld [vmem:[#allocation6 + $0x100] sm:$0xff]  ;;  %225 = vmatpush.msra.mxu1 %v168_v29  ;;  %v179_v13 = vld [vmem:[#allocation6 + $0x378] sm:$0xff] }
  0x1b   :  { %v165_v27 = vld [vmem:[#allocation6 + $0x308] sm:$0xff]  ;;  %249 = vmatpush.msra.mxu2 %v101_v26  ;;  %v164_v33 = vld [vmem:[#allocation6 + $0x300] sm:$0xff]  ;;  %203 = vmatpush.msra.mxu0 %v100_v32  ;;  %v122_v14 = vld [vmem:[#allocation6 + $0x1b0] sm:$0xff] }
  0x1c   :  { %v97_v30 = vld [vmem:[#allocation6 + $0xe8] sm:$0xff]  ;;  %272 = vmatpush.msra.mxu3 %v165_v27  ;;  %v96_v36 = vld [vmem:[#allocation6 + $0xe0] sm:$0xff]  ;;  %226 = vmatpush.msra.mxu1 %v164_v33  ;;  %v186_v15 = vld [vmem:[#allocation6 + $0x3b0] sm:$0xff] }
  0x1d   :  { %v161_v31 = vld [vmem:[#allocation6 + $0x2e8] sm:$0xff]  ;;  %250 = vmatpush.msra.mxu2 %v97_v30  ;;  %v160_v37 = vld [vmem:[#allocation6 + $0x2e0] sm:$0xff]  ;;  %204 = vmatpush.msra.mxu0 %v96_v36  ;;  %v111_v16 = vld [vmem:[#allocation6 + $0x158] sm:$0xff] }
  0x1e   :  { %v93_v34 = vld [vmem:[#allocation6 + $0xc8] sm:$0xff]  ;;  %273 = vmatpush.msra.mxu3 %v161_v31  ;;  %v92_v40 = vld [vmem:[#allocation6 + $0xc0] sm:$0xff]  ;;  %227 = vmatpush.msra.mxu1 %v160_v37  ;;  %v175_v17 = vld [vmem:[#allocation6 + $0x358] sm:$0xff] }
  0x1f   :  { %v157_v35 = vld [vmem:[#allocation6 + $0x2c8] sm:$0xff]  ;;  %251 = vmatpush.msra.mxu2 %v93_v34  ;;  %v156_v41 = vld [vmem:[#allocation6 + $0x2c0] sm:$0xff]  ;;  %205 = vmatpush.msra.mxu0 %v92_v40  ;;  %v118_v18 = vld [vmem:[#allocation6 + $0x190] sm:$0xff] }
  0x20   :  { %v89_v38 = vld [vmem:[#allocation6 + $0xa8] sm:$0xff]  ;;  %274 = vmatpush.msra.mxu3 %v157_v35  ;;  %v88_v44 = vld [vmem:[#allocation6 + $0xa0] sm:$0xff]  ;;  %228 = vmatpush.msra.mxu1 %v156_v41  ;;  %v182_v19 = vld [vmem:[#allocation6 + $0x390] sm:$0xff] }
  0x21   :  { %v153_v39 = vld [vmem:[#allocation6 + $0x2a8] sm:$0xff]  ;;  %252 = vmatpush.msra.mxu2 %v89_v38  ;;  %v152_v45 = vld [vmem:[#allocation6 + $0x2a0] sm:$0xff]  ;;  %206 = vmatpush.msra.mxu0 %v88_v44  ;;  %v107_v20 = vld [vmem:[#allocation6 + $0x138] sm:$0xff] }
  0x22   :  { %v85_v42 = vld [vmem:[#allocation6 + $0x88] sm:$0xff]  ;;  %275 = vmatpush.msra.mxu3 %v153_v39  ;;  %v84_v48 = vld [vmem:[#allocation6 + $0x80] sm:$0xff]  ;;  %229 = vmatpush.msra.mxu1 %v152_v45  ;;  %v171_v21 = vld [vmem:[#allocation6 + $0x338] sm:$0xff] }
  0x23   :  { %v149_v43 = vld [vmem:[#allocation6 + $0x288] sm:$0xff]  ;;  %253 = vmatpush.msra.mxu2 %v85_v42  ;;  %v148_v49 = vld [vmem:[#allocation6 + $0x280] sm:$0xff]  ;;  %207 = vmatpush.msra.mxu0 %v84_v48  ;;  %v114_v22 = vld [vmem:[#allocation6 + $0x170] sm:$0xff] }
  0x24   :  { %v81_v46 = vld [vmem:[#allocation6 + $0x68] sm:$0xff]  ;;  %276 = vmatpush.msra.mxu3 %v149_v43  ;;  %v80_v52 = vld [vmem:[#allocation6 + $0x60] sm:$0xff]  ;;  %230 = vmatpush.msra.mxu1 %v148_v49  ;;  %v178_v23 = vld [vmem:[#allocation6 + $0x370] sm:$0xff] }
  0x25   :  { %v145_v47 = vld [vmem:[#allocation6 + $0x268] sm:$0xff]  ;;  %254 = vmatpush.msra.mxu2 %v81_v46  ;;  %v144_v53 = vld [vmem:[#allocation6 + $0x260] sm:$0xff]  ;;  %208 = vmatpush.msra.mxu0 %v80_v52  ;;  %v103_v24 = vld [vmem:[#allocation6 + $0x118] sm:$0xff] }
  0x26   :  { %v77_v50 = vld [vmem:[#allocation6 + $0x48] sm:$0xff]  ;;  %277 = vmatpush.msra.mxu3 %v145_v47  ;;  %v76_v56 = vld [vmem:[#allocation6 + $0x40] sm:$0xff]  ;;  %231 = vmatpush.msra.mxu1 %v144_v53  ;;  %v167_v25 = vld [vmem:[#allocation6 + $0x318] sm:$0xff] }
  0x27   :  { %v141_v51 = vld [vmem:[#allocation6 + $0x248] sm:$0xff]  ;;  %255 = vmatpush.msra.mxu2 %v77_v50  ;;  %v140_v57 = vld [vmem:[#allocation6 + $0x240] sm:$0xff]  ;;  %209 = vmatpush.msra.mxu0 %v76_v56  ;;  %v110_v28 = vld [vmem:[#allocation6 + $0x150] sm:$0xff] }
  0x28   :  { %v73_v54 = vld [vmem:[#allocation6 + $0x28] sm:$0xff]  ;;  %278 = vmatpush.msra.mxu3 %v141_v51  ;;  %232 = vmatpush.msra.mxu1 %v140_v57  ;;  %v72_v62 = vld [vmem:[#allocation6 + $0x20] sm:$0xff]  ;;  %v174_v29 = vld [vmem:[#allocation6 + $0x350] sm:$0xff] }
  0x29   :  { %v137_v55 = vld [vmem:[#allocation6 + $0x228] sm:$0xff]  ;;  %256 = vmatpush.msra.mxu2 %v73_v54  ;;  %v136_v63 = vld [vmem:[#allocation6 + $0x220] sm:$0xff]  ;;  %210 = vmatpush.msra.mxu0 %v72_v62  ;;  %v99_v30 = vld [vmem:[#allocation6 + $0xf8] sm:$0xff] }
  0x2a   :  { %v69_v58 = vld [vmem:[#allocation6 + $0x8] sm:$0xff]  ;;  %279 = vmatpush.msra.mxu3 %v137_v55  ;;  %v68_v2 = vld [vmem:[#allocation6] sm:$0xff]  ;;  %233 = vmatpush.msra.mxu1 %v136_v63  ;;  %v163_v31 = vld [vmem:[#allocation6 + $0x2f8] sm:$0xff] }
  0x2b   :  { %v133_v59 = vld [vmem:[#allocation6 + $0x208] sm:$0xff]  ;;  %257 = vmatpush.msra.mxu2 %v69_v58  ;;  %v132_v3 = vld [vmem:[#allocation6 + $0x200] sm:$0xff]  ;;  %211 = vmatpush.msra.mxu0 %v68_v2  ;;  %v106_v32 = vld [vmem:[#allocation6 + $0x130] sm:$0xff] }
  0x2c   :  { %280 = vmatpush.msra.mxu3 %v133_v59  ;;  %234 = vmatpush.msra.mxu1 %v132_v3  ;;  %v551_v26 = vld [vmem:[#allocation3] sm:$0xff]  ;;  %v553_v27 = vld [vmem:[#allocation3 + $0x8] sm:$0xff]  ;;  %v170_v33 = vld [vmem:[#allocation6 + $0x330] sm:$0xff] }
  0x2d   :  { %334 = vmatpush.msrb.mxu2 %v131_v60  ;;  %288 = vmatpush.msrb.mxu0 %v130_v6  ;;  %v95_v34 = vld [vmem:[#allocation6 + $0xd8] sm:$0xff]  ;;  %v102_v36 = vld [vmem:[#allocation6 + $0x110] sm:$0xff] }
  0x2e   :  { %357 = vmatpush.msrb.mxu3 %v195_v61  ;;  %311 = vmatpush.msrb.mxu1 %v194_v7  ;;  %v159_v35 = vld [vmem:[#allocation6 + $0x2d8] sm:$0xff]  ;;  %v166_v37 = vld [vmem:[#allocation6 + $0x310] sm:$0xff] }
  0x2f   :  { %335 = vmatpush.msrb.mxu2 %v127_v0  ;;  %289 = vmatpush.msrb.mxu0 %v126_v10  ;;  %v91_v38 = vld [vmem:[#allocation6 + $0xb8] sm:$0xff]  ;;  %v98_v40 = vld [vmem:[#allocation6 + $0xf0] sm:$0xff] }
  0x30   :  { %358 = vmatpush.msrb.mxu3 %v191_v1  ;;  %312 = vmatpush.msrb.mxu1 %v190_v11  ;;  %v155_v39 = vld [vmem:[#allocation6 + $0x2b8] sm:$0xff]  ;;  %v162_v41 = vld [vmem:[#allocation6 + $0x2f0] sm:$0xff] }
  0x31   :  { %336 = vmatpush.msrb.mxu2 %v123_v4  ;;  %290 = vmatpush.msrb.mxu0 %v122_v14  ;;  %v87_v42 = vld [vmem:[#allocation6 + $0x98] sm:$0xff]  ;;  %v66_v44 = vld [vmem:[#allocation3 + $0x10] sm:$0xff] }
  0x32   :  { %359 = vmatpush.msrb.mxu3 %v187_v5  ;;  %313 = vmatpush.msrb.mxu1 %v186_v15  ;;  %v151_v43 = vld [vmem:[#allocation6 + $0x298] sm:$0xff]  ;;  %v94_v46 = vld [vmem:[#allocation6 + $0xd0] sm:$0xff] }
  0x33   :  { %337 = vmatpush.msrb.mxu2 %v119_v8  ;;  %291 = vmatpush.msrb.mxu0 %v118_v18  ;;  %v67_v45 = vld [vmem:[#allocation3 + $0x18] sm:$0xff]  ;;  %v158_v47 = vld [vmem:[#allocation6 + $0x2d0] sm:$0xff] }
  0x34   :  { %360 = vmatpush.msrb.mxu3 %v183_v9  ;;  %314 = vmatpush.msrb.mxu1 %v182_v19  ;;  %v83_v48 = vld [vmem:[#allocation6 + $0x78] sm:$0xff]  ;;  %v90_v50 = vld [vmem:[#allocation6 + $0xb0] sm:$0xff] }
  0x35   :  { %338 = vmatpush.msrb.mxu2 %v115_v12  ;;  %292 = vmatpush.msrb.mxu0 %v114_v22  ;;  %v147_v49 = vld [vmem:[#allocation6 + $0x278] sm:$0xff]  ;;  %v154_v51 = vld [vmem:[#allocation6 + $0x2b0] sm:$0xff] }
  0x36   :  { %361 = vmatpush.msrb.mxu3 %v179_v13  ;;  %315 = vmatpush.msrb.mxu1 %v178_v23  ;;  %v79_v52 = vld [vmem:[#allocation6 + $0x58] sm:$0xff]  ;;  %v86_v54 = vld [vmem:[#allocation6 + $0x90] sm:$0xff] }
  0x37   :  { %339 = vmatpush.msrb.mxu2 %v111_v16  ;;  %281 = vmatmul.f32.vlgmr.msra.gmra.mxu3 %v553_v27  ;;  %v143_v53 = vld [vmem:[#allocation6 + $0x258] sm:$0xff]  ;;  %v150_v55 = vld [vmem:[#allocation6 + $0x290] sm:$0xff] }
  0x38   :  { %362 = vmatpush.msrb.mxu3 %v175_v17  ;;  %258 = vmatmul.f32.vlgmr.msra.gmra.mxu2 %v551_v26  ;;  %v75_v56 = vld [vmem:[#allocation6 + $0x38] sm:$0xff]  ;;  %v82_v58 = vld [vmem:[#allocation6 + $0x70] sm:$0xff] }
  0x39   :  { %340 = vmatpush.msrb.mxu2 %v107_v20  ;;  %293 = vmatpush.msrb.mxu0 %v110_v28  ;;  %v139_v57 = vld [vmem:[#allocation6 + $0x238] sm:$0xff]  ;;  %v146_v59 = vld [vmem:[#allocation6 + $0x270] sm:$0xff] }
  0x3a   :  { %363 = vmatpush.msrb.mxu3 %v171_v21  ;;  %316 = vmatpush.msrb.mxu1 %v174_v29  ;;  %v71_v60 = vld [vmem:[#allocation6 + $0x18] sm:$0xff]  ;;  %v78_v62 = vld [vmem:[#allocation6 + $0x50] sm:$0xff] }
  0x3b   :  { %341 = vmatpush.msrb.mxu2 %v103_v24  ;;  %294 = vmatpush.msrb.mxu0 %v106_v32  ;;  %v135_v61 = vld [vmem:[#allocation6 + $0x218] sm:$0xff]  ;;  %v142_v63 = vld [vmem:[#allocation6 + $0x250] sm:$0xff] }
  0x3c   :  { %364 = vmatpush.msrb.mxu3 %v167_v25  ;;  %317 = vmatpush.msrb.mxu1 %v170_v33  ;;  %v74_v0 = vld [vmem:[#allocation6 + $0x30] sm:$0xff] }
  0x3d   :  { %342 = vmatpush.msrb.mxu2 %v99_v30  ;;  %295 = vmatpush.msrb.mxu0 %v102_v36  ;;  %v138_v1 = vld [vmem:[#allocation6 + $0x230] sm:$0xff] }
  0x3e   :  { %365 = vmatpush.msrb.mxu3 %v163_v31  ;;  %318 = vmatpush.msrb.mxu1 %v166_v37  ;;  %v70_v2 = vld [vmem:[#allocation6 + $0x10] sm:$0xff] }
  0x3f   :  { %343 = vmatpush.msrb.mxu2 %v95_v34  ;;  %212 = vmatmul.f32.vlgmr.msra.gmra.mxu0 %v551_v26  ;;  %v134_v3 = vld [vmem:[#allocation6 + $0x210] sm:$0xff] }
  0x40   :  { %366 = vmatpush.msrb.mxu3 %v159_v35  ;;  %235 = vmatmul.f32.vlgmr.msra.gmra.mxu1 %v553_v27 }
  0x41   :  { %344 = vmatpush.msrb.mxu2 %v91_v38  ;;  %296 = vmatpush.msrb.mxu0 %v98_v40 }
  0x42   :  { %367 = vmatpush.msrb.mxu3 %v155_v39  ;;  %319 = vmatpush.msrb.mxu1 %v162_v41 }
  0x43   :  { %345 = vmatpush.msrb.mxu2 %v87_v42  ;;  %284 = vmatmul.f32.gmra.mxu3 %v67_v45 }
  0x44   :  { %368 = vmatpush.msrb.mxu3 %v151_v43  ;;  %261 = vmatmul.f32.gmra.mxu2 %v66_v44 }
  0x45   :  { %297 = vmatpush.msrb.mxu0 %v94_v46  ;;  %320 = vmatpush.msrb.mxu1 %v158_v47 }
  0x46   :  { %346 = vmatpush.msrb.mxu2 %v83_v48  ;;  %369 = vmatpush.msrb.mxu3 %v147_v49 }
  0x47   :  { %298 = vmatpush.msrb.mxu0 %v90_v50  ;;  %321 = vmatpush.msrb.mxu1 %v154_v51 }
  0x48   :  { %347 = vmatpush.msrb.mxu2 %v79_v52  ;;  %370 = vmatpush.msrb.mxu3 %v143_v53 }
  0x49   :  { %299 = vmatpush.msrb.mxu0 %v86_v54  ;;  %322 = vmatpush.msrb.mxu1 %v150_v55 }
  0x4a   :  { %348 = vmatpush.msrb.mxu2 %v75_v56  ;;  %371 = vmatpush.msrb.mxu3 %v139_v57 }
  0x4b   :  { %215 = vmatmul.f32.gmra.mxu0 %v66_v44  ;;  %238 = vmatmul.f32.gmra.mxu1 %v67_v45 }
  0x4c   :  { %300 = vmatpush.msrb.mxu0 %v82_v58  ;;  %323 = vmatpush.msrb.mxu1 %v146_v59 }
  0x4d   :  { %349 = vmatpush.msrb.mxu2 %v71_v60  ;;  %372 = vmatpush.msrb.mxu3 %v135_v61 }
  0x4e   :  { %350 = vmatmul.f32.vlgmr.msrb.gmra.mxu2 %v551_v26  ;;  %373 = vmatmul.f32.vlgmr.msrb.gmra.mxu3 %v553_v27 }
  0x4f   :  { %301 = vmatpush.msrb.mxu0 %v78_v62  ;;  %324 = vmatpush.msrb.mxu1 %v142_v63 }
  0x51   :  { %302 = vmatpush.msrb.mxu0 %v74_v0  ;;  %325 = vmatpush.msrb.mxu1 %v138_v1 }
  0x53   :  { %303 = vmatpush.msrb.mxu0 %v70_v2  ;;  %326 = vmatpush.msrb.mxu1 %v134_v3 }
  0x54   :  { %304 = vmatmul.f32.vlgmr.msrb.gmra.mxu0 %v551_v26  ;;  %327 = vmatmul.f32.vlgmr.msrb.gmra.mxu1 %v553_v27 }
  0x56   :  { %353 = vmatmul.f32.gmra.mxu2 %v66_v44  ;;  %376 = vmatmul.f32.gmra.mxu3 %v67_v45 }
  0x5c   :  { %307 = vmatmul.f32.gmra.mxu0 %v66_v44  ;;  %330 = vmatmul.f32.gmra.mxu1 %v67_v45 }
  0xba   :  { %v282_v5 = vpop.f32.mrf.mxu3 }
  0xbb   :  { %v259_v4 = vpop.f32.mrf.mxu2 }
  0xbc   :  { %v213_v6 = vpop.f32.mrf.mxu0  ;;  %v283_v8 = vadd.f32 %v282_v5, %v259_v4 }
  0xbd   :  { %v236_v7 = vpop.f32.mrf.mxu1 }
  0xbe   :  { %v237_v9 = vadd.f32 %v236_v7, %v213_v6  ;;  %408 = vst [vmem:[#allocation8 + $0x8] sm:$0xff] %v283_v8 }
  0xc0   :  { %407 = vst [vmem:[#allocation8] sm:$0xff] %v237_v9 }
  0xc6   :  { %v285_v11 = vpop.f32.mrf.mxu3 }
  0xc7   :  { %v262_v10 = vpop.f32.mrf.mxu2 }
  0xc8   :  { %v216_v12 = vpop.f32.mrf.mxu0  ;;  %v239_v13 = vpop.f32.mrf.mxu1  ;;  %v286_v14 = vadd.f32 %v285_v11, %v262_v10 }
  0xc9   :  { %v240_v15 = vadd.f32 %v239_v13, %v216_v12 }
  0xca   :  { %412 = vst [vmem:[#allocation8 + $0x28] sm:$0xff] %v286_v14 }
  0xcb   :  { %411 = vst [vmem:[#allocation8 + $0x20] sm:$0xff] %v240_v15 }
  0xd1   :  { %v305_v16 = vpop.f32.mrf.mxu0  ;;  %v328_v17 = vpop.f32.mrf.mxu1 }
  0xd2   :  { %v329_v18 = vadd.f32 %v328_v17, %v305_v16  ;;  %v351_v19 = vpop.f32.mrf.mxu2  ;;  %v374_v20 = vpop.f32.mrf.mxu3 }
  0xd3   :  { %v375_v21 = vadd.f32 %v374_v20, %v351_v19 }
  0xd4   :  { %409 = vst [vmem:[#allocation8 + $0x10] sm:$0xff] %v329_v18 }
  0xd5   :  { %410 = vst [vmem:[#allocation8 + $0x18] sm:$0xff] %v375_v21 }
  0xd9   :  { %v308_v22 = vpop.f32.mrf.mxu0  ;;  %v331_v23 = vpop.f32.mrf.mxu1 }
  0xda   :  { %v332_v24 = vadd.f32 %v331_v23, %v308_v22  ;;  %v354_v25 = vpop.f32.mrf.mxu2  ;;  %v377_v26 = vpop.f32.mrf.mxu3 }
  0xdb   :  { %v378_v27 = vadd.f32 %v377_v26, %v354_v25 }
  0xdc   :  { %413 = vst [vmem:[#allocation8 + $0x30] sm:$0xff] %v332_v24 }
  0xdd   :  { %414 = vst [vmem:[#allocation8 + $0x38] sm:$0xff] %v378_v27 }
  0xde   :  { %427 = dma.vmem_to_hbm [thread:$0]  %s420_s1, 1024, %s422_s25, [#allocation5], %s524_s21, %s524_s21, %s525_s22  }
  0xdf   :  { %518 = dma.done.wait [#allocation5], 1024  }
  0xe0   :  { %519 = vsyncadd [#allocation5], 4294966272 }
  0xe1   :  { %432 = vsyncpa [#allocation4], 1 }
  0xe2   :  { %433 = vsyncpa [#allocation7], 1 }
  0xe3   :  { %434 = vsyncpa [#allocation5], 1 }

</bundles_post_ra>
